<compile_context>
chip_gen: v7x
topology: tpu7x:2x2x1
jax: 0.10.0
libtpu: 0.0.40
codegen_flags: <defaults>
</compile_context>

<pallas_src>
import functools

import jax
import jax.numpy as jnp
from jax.experimental import pallas as pl
from jax.experimental.pallas import tpu as pltpu

_LANES = 128


def _cdiv(a: int, b: int) -> int:
    return -(-a // b)


def _round_up(n: int, m: int) -> int:
    return _cdiv(n, m) * m


def _rnd_mlp_kernel(x_ref, w1_ref, b1_ref, w2_ref, b2_ref, o_ref):
    """One batch tile: relu(x @ W1 + b1) @ W2 + b2 (f32 accumulation)."""
    h = jnp.dot(x_ref[...], w1_ref[...], preferred_element_type=jnp.float32)
    h = jnp.maximum(h + b1_ref[...], 0.0)          # bias is a (1, hidden) row
    y = jnp.dot(h.astype(w2_ref.dtype), w2_ref[...],
                preferred_element_type=jnp.float32)
    o_ref[...] = (y + b2_ref[...]).astype(o_ref.dtype)


def _rnd_mlp_kernel_packed(x_ref, w1_ref, b1_ref, w2_ref, b2_ref, o_ref, y_scr):
    """Same math, but `pack` consecutive batch rows are interleaved into one
    128-lane output row so the VMEM->HBM writeback is lane-dense."""
    out_dim = w2_ref.shape[1]
    pack = o_ref.shape[1] // out_dim
    tp = o_ref.shape[0]

    h = jnp.dot(x_ref[...], w1_ref[...], preferred_element_type=jnp.float32)
    h = jnp.maximum(h + b1_ref[...], 0.0)
    y = jnp.dot(h.astype(w2_ref.dtype), w2_ref[...],
                preferred_element_type=jnp.float32)
    y_scr[...] = (y + b2_ref[...]).astype(o_ref.dtype)

    # Interleave: packed row p, lanes [j*out_dim, (j+1)*out_dim) <- row p*pack+j.
    # Row-major bytes are identical to the (tb, out_dim) layout, so unpacking
    # outside the kernel is a free reshape. The strided sublane reads are
    # XLU/VPU work hidden under the HBM-bound pipeline.
    # TODO(synk): optionally fuse the downstream RND-bonus reduction
    # (||pred - target||^2 per row) here so the (B, out_dim) activations never
    # round-trip HBM at all.
    for j in range(pack):
        o_ref[:, j * out_dim:(j + 1) * out_dim] = (
            y_scr[pl.ds(j, tp, stride=pack), :])


def _choose_batch_tile(batch: int, block_batch: int, row_align: int) -> int:
    """Rows per grid step: multiple of row_align, roughly block_batch, and for
    large batches at least 2 (even) grid steps so both v7x cores get work."""
    if batch <= 2 * row_align:
        return _round_up(max(batch, 1), row_align)
    n = _cdiv(batch, max(block_batch, row_align))
    n = max(2, n + (n % 2))                       # >=2 tiles, even when possible
    return _round_up(_cdiv(batch, n), row_align)


@functools.partial(jax.jit, static_argnames=("block_batch", "pack_output"))
def rnd_network_1d(x, w1, b1, w2, b2, *, block_batch: int = 4096,
                   pack_output: bool = True):
    """Forward pass of RNDNetwork1D.

    x:  (B, obs_dim)
    w1: (obs_dim, 128), b1: (128,)
    w2: (128, output_dim), b2: (output_dim,)
    returns (B, output_dim) in x.dtype

    block_batch: target rows per grid step (4096-8192 amortizes per-step cost).
    pack_output: interleave 128 // output_dim batch rows per output row so the
                 HBM writeback is lane-dense (falls back automatically if
                 output_dim does not divide 128).
    """
    out_dtype = x.dtype
    B, obs_dim = x.shape
    hidden = w1.shape[1]
    out_dim = w2.shape[1]
    out_itemsize = jnp.dtype(out_dtype).itemsize

    # Biases as (1, N) rows: live naturally in VMEM and broadcast over the
    # batch tile; the add happens on the f32 accumulator.
    b1_2d = b1.reshape(1, hidden).astype(jnp.float32)
    b2_2d = b2.reshape(1, out_dim).astype(jnp.float32)

    pack = _LANES // out_dim if (0 < out_dim <= _LANES and _LANES % out_dim == 0) else 1
    use_pack = pack_output and pack > 1

    row_align = 8 * pack if use_pack else 8       # keeps packed out block 8-row aligned
    tb = _choose_batch_tile(B, block_batch, row_align)
    num_tiles = _cdiv(B, tb)

    # VMEM footprint (lane-padded, x/out double-buffered) -> scoped limit with
    # 2x headroom, clamped to [32 MiB, 56 MiB] (<= v7x's 64 MiB physical VMEM).
    def _lanes(n):
        return _round_up(n, _LANES)
    est = (2 * tb * _lanes(obs_dim) * jnp.dtype(x.dtype).itemsize            # x tiles
           + (2 * (tb // pack) * _LANES * out_itemsize if use_pack
              else 2 * tb * _lanes(out_dim) * out_itemsize)                  # out tiles
           + tb * _lanes(hidden) * 4                                         # h (f32)
           + (tb * _lanes(out_dim) * out_itemsize if use_pack else 0)        # scratch
           + (1 << 20))                                                      # weights/misc
    vmem_limit = int(min(56 << 20, max(32 << 20, 2 * est)))

    in_specs = [
        pl.BlockSpec((tb, obs_dim), lambda i: (i, 0)),       # x: one tile per step
        pl.BlockSpec((obs_dim, hidden), lambda i: (0, 0)),   # W1: VMEM-resident
        pl.BlockSpec((1, hidden), lambda i: (0, 0)),         # b1: VMEM-resident
        pl.BlockSpec((hidden, out_dim), lambda i: (0, 0)),   # W2: VMEM-resident
        pl.BlockSpec((1, out_dim), lambda i: (0, 0)),        # b2: VMEM-resident
    ]
    cparams = pltpu.CompilerParams(
        dimension_semantics=("parallel",),                   # batch tiles independent
        vmem_limit_bytes=vmem_limit)

    if use_pack:
        tp = tb // pack
        p_total = _cdiv(B, pack)
        out = pl.pallas_call(
            _rnd_mlp_kernel_packed,
            out_shape=jax.ShapeDtypeStruct((p_total, _LANES), out_dtype),
            grid_spec=pltpu.PrefetchScalarGridSpec(
                num_scalar_prefetch=0,
                grid=(num_tiles,),
                in_specs=in_specs,
                out_specs=pl.BlockSpec((tp, _LANES), lambda i: (i, 0)),
                scratch_shapes=[pltpu.VMEM((tb, out_dim), out_dtype)],
            ),
            compiler_params=cparams,
        )(x, w1, b1_2d, w2, b2_2d)
        # Packed rows hold `pack` consecutive batch rows -> identical row-major
        # bytes, so this reshape is free; the slice only triggers (and only
        # touches the output stream) when B is not a multiple of `pack`.
        out = out.reshape(p_total * pack, out_dim)
        if p_total * pack != B:
            out = out[:B]
        return out

    out = pl.pallas_call(
        _rnd_mlp_kernel,
        out_shape=jax.ShapeDtypeStruct((B, out_dim), out_dtype),
        grid_spec=pltpu.PrefetchScalarGridSpec(
            num_scalar_prefetch=0,
            grid=(num_tiles,),
            in_specs=in_specs,
            out_specs=pl.BlockSpec((tb, out_dim), lambda i: (i, 0)),
        ),
        compiler_params=cparams,
    )(x, w1, b1_2d, w2, b2_2d)
    return out


def init_params(key, obs_dim, output_dim=32, hidden=128, dtype=jnp.float32):
    """Deterministic synthetic parameters (Kaiming-uniform-ish scaling)."""
    k1, k2, k3, k4 = jax.random.split(key, 4)
    lim1 = 1.0 / jnp.sqrt(obs_dim)
    lim2 = 1.0 / jnp.sqrt(hidden)
    w1 = jax.random.uniform(k1, (obs_dim, hidden), dtype, -lim1, lim1)
    b1 = jax.random.uniform(k2, (hidden,), dtype, -lim1, lim1)
    w2 = jax.random.uniform(k3, (hidden, output_dim), dtype, -lim2, lim2)
    b2 = jax.random.uniform(k4, (output_dim,), dtype, -lim2, lim2)
    return w1, b1, w2, b2


def _ref_forward(x, w1, b1, w2, b2):
    return jnp.maximum(x @ w1 + b1, 0.0) @ w2 + b2


if __name__ == "__main__":
    key = jax.random.PRNGKey(0)
    k_x, k_p, k_b, k_c = jax.random.split(key, 4)

    obs_dim, output_dim = 16, 32
    w1, b1, w2, b2 = init_params(k_p, obs_dim, output_dim)

    # Small case from the module spec (B=2): single ragged tile, packed output.
    x = jax.random.normal(k_x, (2, obs_dim), dtype=jnp.float32)
    y = jax.block_until_ready(rnd_network_1d(x, w1, b1, w2, b2))
    ref = _ref_forward(x, w1, b1, w2, b2)
    assert y.shape == (2, output_dim)
    assert jnp.allclose(y, ref, atol=1e-5, rtol=1e-5)

    # Multi-tile case: ragged last tile AND ragged pack tail (301 % 4 != 0).
    x2 = jax.random.normal(k_b, (301, obs_dim), dtype=jnp.float32)
    y2 = jax.block_until_ready(
        rnd_network_1d(x2, w1, b1, w2, b2, block_batch=128))
    ref2 = _ref_forward(x2, w1, b1, w2, b2)
    assert y2.shape == (301, output_dim)
    assert jnp.allclose(y2, ref2, atol=1e-5, rtol=1e-5)

    # Fallback (lane-sparse output) path, also with a ragged tail.
    x3 = jax.random.normal(k_c, (37, obs_dim), dtype=jnp.float32)
    y3 = jax.block_until_ready(
        rnd_network_1d(x3, w1, b1, w2, b2, block_batch=128, pack_output=False))
    ref3 = _ref_forward(x3, w1, b1, w2, b2)
    assert y3.shape == (37, output_dim)
    assert jnp.allclose(y3, ref3, atol=1e-5, rtol=1e-5)

    print("KERNEL_OK")
</pallas_src>

<mosaic_0001>
module attributes {stable_mosaic.version = 11 : i64} {
  func.func @_rnd_mlp_kernel_packed(%arg0: i32, %arg1: memref<32x16xf32, #tpu.memory_space<vmem>>, %arg2: memref<16x128xf32, #tpu.memory_space<vmem>>, %arg3: memref<1x128xf32, #tpu.memory_space<vmem>>, %arg4: memref<128x32xf32, #tpu.memory_space<vmem>>, %arg5: memref<1x32xf32, #tpu.memory_space<vmem>>, %arg6: memref<8x128xf32, #tpu.memory_space<vmem>>, %arg7: memref<32x32xf32, #tpu.memory_space<vmem>>) attributes {dimension_semantics = [#tpu.dimension_semantics<parallel>], iteration_bounds = array<i64: 1>, scalar_prefetch = 0 : i64, scratch_operands = 1 : i64, tpu.core_type = #tpu.core_type<tc>, window_params = [{transform_indices = @transform_0, window_bounds = array<i64: 32, 16>}, {pipeline_mode = #tpu.pipeline_mode<synchronous>, transform_indices = @transform_1, window_bounds = array<i64: 16, 128>}, {pipeline_mode = #tpu.pipeline_mode<synchronous>, transform_indices = @transform_2, window_bounds = array<i64: 1, 128>}, {pipeline_mode = #tpu.pipeline_mode<synchronous>, transform_indices = @transform_3, window_bounds = array<i64: 128, 32>}, {pipeline_mode = #tpu.pipeline_mode<synchronous>, transform_indices = @transform_4, window_bounds = array<i64: 1, 32>}, {transform_indices = @transform_5, window_bounds = array<i64: 8, 128>}]} {
    %c0 = arith.constant 0 : index
    %c0_0 = arith.constant 0 : index
    %0 = vector.load %arg1[%c0, %c0_0] : memref<32x16xf32, #tpu.memory_space<vmem>>, vector<32x16xf32>
    %c0_1 = arith.constant 0 : index
    %c0_2 = arith.constant 0 : index
    %1 = vector.load %arg2[%c0_1, %c0_2] : memref<16x128xf32, #tpu.memory_space<vmem>>, vector<16x128xf32>
    %cst = arith.constant dense<0.000000e+00> : vector<32x128xf32>
    %2 = tpu.matmul %0, %1, %cst {dimension_numbers = #tpu.dot_dimension_numbers<[1], [0], [0], [1], [0, 0, 1, 1], [], []>} : vector<32x16xf32>, vector<16x128xf32>, vector<32x128xf32> -> vector<32x128xf32>
    %c0_3 = arith.constant 0 : index
    %c0_4 = arith.constant 0 : index
    %3 = vector.load %arg3[%c0_3, %c0_4] : memref<1x128xf32, #tpu.memory_space<vmem>>, vector<1x128xf32>
    %4 = vector.broadcast %3 : vector<1x128xf32> to vector<32x128xf32>
    %5 = arith.addf %2, %4 : vector<32x128xf32>
    %cst_5 = arith.constant 0.000000e+00 : f32
    %6 = vector.broadcast %cst_5 : f32 to vector<32x128xf32>
    %7 = arith.maximumf %5, %6 : vector<32x128xf32>
    %c0_6 = arith.constant 0 : index
    %c0_7 = arith.constant 0 : index
    %8 = vector.load %arg4[%c0_6, %c0_7] : memref<128x32xf32, #tpu.memory_space<vmem>>, vector<128x32xf32>
    %cst_8 = arith.constant dense<0.000000e+00> : vector<32x32xf32>
    %9 = tpu.matmul %7, %8, %cst_8 {dimension_numbers = #tpu.dot_dimension_numbers<[1], [0], [0], [1], [0, 0, 1, 1], [], []>} : vector<32x128xf32>, vector<128x32xf32>, vector<32x32xf32> -> vector<32x32xf32>
    %c0_9 = arith.constant 0 : index
    %c0_10 = arith.constant 0 : index
    %10 = vector.load %arg5[%c0_9, %c0_10] : memref<1x32xf32, #tpu.memory_space<vmem>>, vector<1x32xf32>
    %11 = vector.broadcast %10 : vector<1x32xf32> to vector<32x32xf32>
    %12 = arith.addf %9, %11 : vector<32x32xf32>
    %c0_11 = arith.constant 0 : index
    %c0_12 = arith.constant 0 : index
    %13 = vector.load %arg7[%c0_11, %c0_12] : memref<32x32xf32, #tpu.memory_space<vmem>>, vector<32x32xf32>
    tpu.vector_store %arg7[%c0_11, %c0_12], %12 {strides = array<i32>} : memref<32x32xf32, #tpu.memory_space<vmem>>, vector<32x32xf32>,
    %c0_13 = arith.constant 0 : index
    %c0_14 = arith.constant 0 : index
    %14 = tpu.strided_load %arg7[%c0_13, %c0_14] {strides = array<i32: 4, 1>} : memref<32x32xf32, #tpu.memory_space<vmem>>, vector<8x32xf32>
    %c0_15 = arith.constant 0 : index
    %c0_16 = arith.constant 0 : index
    %15 = vector.load %arg6[%c0_15, %c0_16] : memref<8x128xf32, #tpu.memory_space<vmem>>, vector<8x32xf32>
    tpu.vector_store %arg6[%c0_15, %c0_16], %14 {strides = array<i32>} : memref<8x128xf32, #tpu.memory_space<vmem>>, vector<8x32xf32>,
    %c1 = arith.constant 1 : index
    %c0_17 = arith.constant 0 : index
    %16 = tpu.strided_load %arg7[%c1, %c0_17] {strides = array<i32: 4, 1>} : memref<32x32xf32, #tpu.memory_space<vmem>>, vector<8x32xf32>
    %c0_18 = arith.constant 0 : index
    %c32 = arith.constant 32 : index
    %17 = vector.load %arg6[%c0_18, %c32] : memref<8x128xf32, #tpu.memory_space<vmem>>, vector<8x32xf32>
    tpu.vector_store %arg6[%c0_18, %c32], %16 {strides = array<i32>} : memref<8x128xf32, #tpu.memory_space<vmem>>, vector<8x32xf32>,
    %c2 = arith.constant 2 : index
    %c0_19 = arith.constant 0 : index
    %18 = tpu.strided_load %arg7[%c2, %c0_19] {strides = array<i32: 4, 1>} : memref<32x32xf32, #tpu.memory_space<vmem>>, vector<8x32xf32>
    %c0_20 = arith.constant 0 : index
    %c64 = arith.constant 64 : index
    %19 = vector.load %arg6[%c0_20, %c64] : memref<8x128xf32, #tpu.memory_space<vmem>>, vector<8x32xf32>
    tpu.vector_store %arg6[%c0_20, %c64], %18 {strides = array<i32>} : memref<8x128xf32, #tpu.memory_space<vmem>>, vector<8x32xf32>,
    %c3 = arith.constant 3 : index
    %c0_21 = arith.constant 0 : index
    %20 = tpu.strided_load %arg7[%c3, %c0_21] {strides = array<i32: 4, 1>} : memref<32x32xf32, #tpu.memory_space<vmem>>, vector<8x32xf32>
    %c0_22 = arith.constant 0 : index
    %c96 = arith.constant 96 : index
    %21 = vector.load %arg6[%c0_22, %c96] : memref<8x128xf32, #tpu.memory_space<vmem>>, vector<8x32xf32>
    tpu.vector_store %arg6[%c0_22, %c96], %20 {strides = array<i32>} : memref<8x128xf32, #tpu.memory_space<vmem>>, vector<8x32xf32>,
    return
  }
  func.func @transform_0(%arg0: i32) -> (i32, i32) {
    %c0_i32 = arith.constant 0 : i32
    %c0_i32_0 = arith.constant 0 : i32
    return %arg0, %c0_i32 : i32, i32
  }
  func.func @transform_1(%arg0: i32) -> (i32, i32) {
    %c0_i32 = arith.constant 0 : i32
    %c0_i32_0 = arith.constant 0 : i32
    %c0_i32_1 = arith.constant 0 : i32
    return %c0_i32, %c0_i32_0 : i32, i32
  }
  func.func @transform_2(%arg0: i32) -> (i32, i32) {
    %c0_i32 = arith.constant 0 : i32
    %c0_i32_0 = arith.constant 0 : i32
    %c0_i32_1 = arith.constant 0 : i32
    return %c0_i32, %c0_i32_0 : i32, i32
  }
  func.func @transform_3(%arg0: i32) -> (i32, i32) {
    %c0_i32 = arith.constant 0 : i32
    %c0_i32_0 = arith.constant 0 : i32
    %c0_i32_1 = arith.constant 0 : i32
    return %c0_i32, %c0_i32_0 : i32, i32
  }
  func.func @transform_4(%arg0: i32) -> (i32, i32) {
    %c0_i32 = arith.constant 0 : i32
    %c0_i32_0 = arith.constant 0 : i32
    %c0_i32_1 = arith.constant 0 : i32
    return %c0_i32, %c0_i32_0 : i32, i32
  }
  func.func @transform_5(%arg0: i32) -> (i32, i32) {
    %c0_i32 = arith.constant 0 : i32
    %c0_i32_0 = arith.constant 0 : i32
    return %arg0, %c0_i32 : i32, i32
  }
}

</mosaic_0001>

<bundles_post_ra>
// kernel: rnd_network_1d.1
= control target key start
LH: loop header
LB: loop body
LE: loop exit
PB: predicated region body
PF: predicated region fallthrough
CT: control target
= control target key end

     0   :  { %vm33_vm0 = vcmask 130048   ;;  %vm243_vm1 = vcmask 261120   ;;  %s434_s12 = smov 64   ;;  %vm256_vm2 = vcmask 523520   ;;  %vm264_vm3 = vcmask 785920   ;;  %s549_s0 = inlined_call_operand.vmem [shape: f32[2,16], index: 0, kind: input, shape index: {}]   ;;  %s550_s1 = inlined_call_operand.vmem [shape: f32[16,128], index: 1, kind: input, shape index: {}]   ;;  %s551_s2 = inlined_call_operand.vmem [shape: f32[1,128], index: 2, kind: input, shape index: {}]   ;;  %s552_s3 = inlined_call_operand.vmem [shape: f32[128,32], index: 3, kind: input, shape index: {}]   ;;  %s553_s4 = inlined_call_operand.vmem [shape: f32[1,32], index: 4, kind: input, shape index: {}]   ;;  %s554_s5 = inlined_call_operand.vmem [shape: f32[1,128], index: 5, kind: output, shape index: {}]  }
   0x1   :  { %v24_v0 = vld [vmem:[%s550_s1] sm:$0xff]  ;;  %v25_v1 = vld [vmem:[%s550_s1 + $0x8] sm:$0xff]  ;;  %v137_v6 = vld [vmem:[%s552_s3 + $0x10] sm:$0xff]  ;;  %vm272_vm4 = vcmask 1048320  }
   0x2   :  { %v20_v2 = vld [vmem:[%s549_s0] sm:$0xff]  ;;  %v393_v3 = vpack.c.bf16 %v25_v1, %v24_v0  ;;  %v136_v5 = vld [vmem:[%s552_s3 + $0x8] sm:$0xff]  ;;  %v138_v8 = vld [vmem:[%s552_s3 + $0x18] sm:$0xff] }
   0x3   :  { %349 = vmatprep.mubr.msk.f32.mxu0 %vm33_vm0, %v20_v2  ;;  %v135_v4 = vld [vmem:[%s552_s3] sm:$0xff]  ;;  %v21_v9 = vld [vmem:[%s549_s0 + $0x8] sm:$0xff]  ;;  %v401_v10 = vpack.c.bf16 %v138_v8, %v137_v6  ;;  %v22_v13 = vld [vmem:[%s549_s0 + $0x10] sm:$0xff] }
   0x4   :  { %394 = vmatprep.subr.bf16.mxu0 %v393_v3  ;;  %v397_v7 = vpack.c.bf16 %v136_v5, %v135_v4  ;;  %v139_v11 = vld [vmem:[%s552_s3 + $0x20] sm:$0xff]  ;;  %v140_v12 = vld [vmem:[%s552_s3 + $0x28] sm:$0xff]  ;;  %v23_v15 = vld [vmem:[%s549_s0 + $0x18] sm:$0xff] }
   0x5   :  { %396 = vmatpush3.bf16.msra.mxu0 %v393_v3  ;;  %v405_v14 = vpack.c.bf16 %v140_v12, %v139_v11  ;;  %v141_v16 = vld [vmem:[%s552_s3 + $0x30] sm:$0xff]  ;;  %v142_v17 = vld [vmem:[%s552_s3 + $0x38] sm:$0xff]  ;;  %v143_v19 = vld [vmem:[%s552_s3 + $0x40] sm:$0xff] }
   0x6   :  { %398 = vmatprep.subr.bf16.mxu1 %v397_v7  ;;  %v409_v18 = vpack.c.bf16 %v142_v17, %v141_v16  ;;  %v144_v20 = vld [vmem:[%s552_s3 + $0x48] sm:$0xff]  ;;  %v145_v22 = vld [vmem:[%s552_s3 + $0x50] sm:$0xff]  ;;  %v146_v23 = vld [vmem:[%s552_s3 + $0x58] sm:$0xff] }
   0x7   :  { %400 = vmatpush3.bf16.msra.mxu1 %v397_v7  ;;  %v413_v21 = vpack.c.bf16 %v144_v20, %v143_v19  ;;  %v417_v24 = vpack.c.bf16 %v146_v23, %v145_v22  ;;  %v147_v25 = vld [vmem:[%s552_s3 + $0x60] sm:$0xff]  ;;  %v148_v26 = vld [vmem:[%s552_s3 + $0x68] sm:$0xff]  ;;  %v149_v28 = vld [vmem:[%s552_s3 + $0x70] sm:$0xff] }
   0x8   :  { %350 = vmatmul.mubr.msk.f32.vlgmr.msra.gmra.mrb[0].mxu0 %vm33_vm0, %v21_v9  ;;  %402 = vmatprep.subr.bf16.mxu1 %v401_v10  ;;  %v421_v27 = vpack.c.bf16 %v148_v26, %v147_v25  ;;  %v150_v29 = vld [vmem:[%s552_s3 + $0x78] sm:$0xff]  ;;  %v313_v31 = vld [vmem:[%s551_s2] ss:$0 sm:$0xff]  ;;  %s432_s2 = smov 96  }
   0x9   :  { %352 = vmatprep.mubr.msk.f32.mxu0 %vm33_vm0, %v22_v13  ;;  %v425_v30 = vpack.c.bf16 %v150_v29, %v149_v28  ;;  %v318_v44 = vld [vmem:[%s553_s4] ss:$0 sm:$0xff]  ;;  %s433_s4 = smov 32  }
   0xb   :  { %404 = vmatpush3.bf16.msra.mxu1 %v401_v10 }
   0xc   :  { %353 = vmatmul.mubr.msk.f32.gmra.mrb[2].mxu0 %vm33_vm0, %v23_v15  ;;  %406 = vmatprep.subr.bf16.mxu1 %v405_v14 }
   0xf   :  { %408 = vmatpush3.bf16.msra.mxu1 %v405_v14 }
  0x10   :  { %410 = vmatprep.subr.bf16.mxu1 %v409_v18 }
  0x13   :  { %412 = vmatpush3.bf16.msra.mxu1 %v409_v18 }
  0x14   :  { %414 = vmatprep.subr.bf16.mxu1 %v413_v21 }
  0x17   :  { %416 = vmatpush3.bf16.msra.mxu1 %v413_v21 }
  0x18   :  { %418 = vmatprep.subr.bf16.mxu1 %v417_v24 }
  0x1b   :  { %420 = vmatpush3.bf16.msra.mxu1 %v417_v24 }
  0x1c   :  { %422 = vmatprep.subr.bf16.mxu1 %v421_v27 }
  0x1f   :  { %424 = vmatpush3.bf16.msra.mxu1 %v421_v27 }
  0x20   :  { %426 = vmatprep.subr.bf16.mxu1 %v425_v30 }
  0x23   :  { %428 = vmatpush3.bf16.msra.mxu1 %v425_v30 }
  0xdb   :  { %v351_v32 = vpop.f32.mrb[0].mxu0 }
  0xdc   :  { %v118_v33 = vadd.f32 %v351_v32, %v313_v31  ;;  %v112_v34 = vpop.f32.mrb[1].mxu0 }
  0xdd   :  { %v113_v35 = vadd.f32 %v313_v31, %v112_v34 }
  0xde   :  { %v132_v38 = vmax.f32 %v118_v33, 0.0 }
  0xdf   :  { %v354_v36 = vpop.f32.mrb[2].mxu0  ;;  %v131_v37 = vmax.f32 %v113_v35, 0.0 }
  0xe0   :  { %v128_v39 = vadd.f32 %v354_v36, %v313_v31  ;;  %v122_v40 = vpop.f32.mrb[3].mxu0 }
  0xe1   :  { %v123_v41 = vadd.f32 %v313_v31, %v122_v40  ;;  %387 = vmatprep.mubr.f32.mxu1 %v131_v37 }
  0xe2   :  { %388 = vmatmul.mubr.f32.vlgmr.msra.gmra.mrb[0].mxu1 %v132_v38  ;;  %v134_v43 = vmax.f32 %v128_v39, 0.0 }
  0xe3   :  { %v133_v42 = vmax.f32 %v123_v41, 0.0 }
  0xe5   :  { %390 = vmatprep.mubr.f32.mxu1 %v133_v42 }
  0xe6   :  { %391 = vmatmul.mubr.f32.gmra.mrb[2].mxu1 %v134_v43 }
 0x1b5   :  { %v389_v45 = vpop.f32.mrb[0].mxu1 }
 0x1b6   :  { %v230_v46 = vadd.f32 %v389_v45, %v318_v44  ;;  %v224_v47 = vpop.f32.mrb[1].mxu1 }
 0x1b7   :  { %v225_v48 = vadd.f32 %v318_v44, %v224_v47 }
 0x1b8   :  { %245 = vst.msk [vmem:[#allocation2 + $0x8] sm:$0xff] %vm243_vm1, %v230_v46 }
 0x1b9   :  { %244 = vst.msk [vmem:[#allocation2] sm:$0xff] %vm243_vm1, %v225_v48  ;;  %v392_v49 = vpop.f32.mrb[2].mxu1 }
 0x1ba   :  { %v240_v50 = vadd.f32 %v392_v49, %v318_v44  ;;  %v234_v51 = vpop.f32.mrb[3].mxu1 }
 0x1bb   :  { %v235_v52 = vadd.f32 %v318_v44, %v234_v51 }
 0x1bc   :  { %247 = vst.msk [vmem:[#allocation2 + $0x18] sm:$0xff] %vm243_vm1, %v240_v50 }
 0x1bd   :  { %246 = vst.msk [vmem:[#allocation2 + $0x10] sm:$0xff] %vm243_vm1, %v235_v52 }
 0x1c4   :  { %v267_v53 = vld [vmem:[#allocation2 + $0x3] ss:$4 sm:$0xff]  ;;  %v251_v54 = vld [vmem:[#allocation2 + $0x1] ss:$4 sm:$0xff]  ;;  %v248_v55 = vld [vmem:[#allocation2] ss:$4 sm:$0xff] }
 0x1c5   :  { %269 = vrot.lane.b32.xlu1 %v267_v53, %s432_s2  ;;  %253 = vrot.lane.b32.xlu0 %v251_v54, %s433_s4  ;;  %249 = vst.msk [vmem:[#allocation3] sm:$0xff] %vm243_vm1, %v248_v55  ;;  %v259_v56 = vld [vmem:[#allocation2 + $0x2] ss:$4 sm:$0xff] }
 0x1c9   :  { %261 = vrot.lane.b32.xlu0 %v259_v56, %s434_s12 }
 0x237   :  { %v254_v57 = vpop.permute.xlu0 %253  ;;  %v270_v59 = vpop.permute.xlu1 %269 }
 0x238   :  { %257 = vst.msk [vmem:[#allocation3] sm:$0xff] %vm256_vm2, %v254_v57 }
 0x23b   :  { %v262_v58 = vpop.permute.xlu0 %261 }
 0x23c   :  { %265 = vst.msk [vmem:[#allocation3] sm:$0xff] %vm264_vm3, %v262_v58 }
 0x23d   :  { %273 = vst.msk [vmem:[#allocation3] sm:$0xff] %vm272_vm4, %v270_v59 }
 0x244   :  { %v291_v60 = vld [vmem:[#allocation3] sm:$0x1] }
 0x245   :  { %292 = vst [vmem:[%s554_s5] sm:$0x1] %v291_v60 }

</bundles_post_ra>
